<compile_context>
chip_gen: v7x
topology: tpu7x:2x2x1
jax: 0.10.0
libtpu: 0.0.40
codegen_flags: <defaults>
</compile_context>

<pallas_src>
import functools

import jax
import jax.numpy as jnp
import numpy as np
from jax.experimental import pallas as pl
from jax.experimental.pallas import tpu as pltpu

_MIB = 1024 * 1024
_MULTI_STEP_MIN_BYTES = 4 * _MIB     # below this total, a single grid step wins


# ----------------------------------------------------------------------------
# Generation-aware policy
# ----------------------------------------------------------------------------
@functools.lru_cache(maxsize=1)
def _chip_config():
    """VMEM limit / per-step byte budget / minimum grid steps per generation."""
    vmem_cap = None
    try:
        vmem_cap = int(pltpu.get_tpu_info().vmem_capacity_bytes)
    except Exception:
        vmem_cap = None
    kind = ""
    try:
        kind = jax.devices()[0].device_kind.lower()
    except Exception:
        pass
    # v7x: two TensorCores per chip, 64 MiB VMEM per core.
    two_tc = ("7" in kind) or (vmem_cap is not None and vmem_cap <= 64 * _MIB)
    if vmem_cap is None:
        vmem_cap = 64 * _MIB if two_tc else 128 * _MIB
    if two_tc:
        vmem_limit = min(48 * _MIB, (vmem_cap * 3) // 4)
        step_budget = max(4 * _MIB, vmem_limit // 5)   # ~10 MiB on 64 MiB parts
        min_steps = 4                                  # >=2 pipelined steps / TC
    else:
        # v5e / v6e: single TC, 128 MiB VMEM -> few, big double-buffered blocks.
        vmem_limit = min(100 * _MIB, (vmem_cap * 3) // 4)   # ~96 MiB
        step_budget = max(8 * _MIB, vmem_limit // 4)        # ~24 MiB
        min_steps = 1
    return {"vmem_limit": vmem_limit,
            "step_budget": step_budget,
            "min_steps": min_steps}


# ----------------------------------------------------------------------------
# Kernels
# ----------------------------------------------------------------------------
def _beam_group_kernel(a_ref, b_ref, o_ref):
    # a_ref: (gt, beam, nhu)  target-side rows for gt beam groups
    # b_ref: (gt, nhu, sz2)   one source representative per group (the beam
    #                         axis is squeezed away by the BlockSpec)
    # o_ref: (gt, beam, sz2)  3-D block: no in-kernel sublane relayout
    o_ref[...] = jnp.einsum(
        "gbk,gkn->gbn", a_ref[...], b_ref[...],
        preferred_element_type=jnp.float32,
    ).astype(o_ref.dtype)


def _bmm_m1_kernel(a_ref, b_ref, o_ref):
    # a_ref: (bt, K) sublane-dense rows; b_ref: (bt, K, N); o_ref: (bt, N).
    # VPU multiply + sublane reduce: trivially mem-bound, keeps loads/stores
    # dense and avoids a degenerate (M = 1) batched-MXU lowering.
    a = a_ref[...].astype(jnp.float32)
    b = b_ref[...].astype(jnp.float32)
    o_ref[...] = jnp.sum(a[:, :, None] * b, axis=1).astype(o_ref.dtype)


def _bmm_kernel(a_ref, b_ref, o_ref):
    # General fallback: a_ref (bt, M, K), b_ref (bt, K, N), o_ref (bt, M, N).
    o_ref[...] = jnp.einsum(
        "bmk,bkn->bmn", a_ref[...], b_ref[...],
        preferred_element_type=jnp.float32,
    ).astype(o_ref.dtype)


# ----------------------------------------------------------------------------
# Tile-size selection (bytes-moved / step-count driven; not MXU driven)
# ----------------------------------------------------------------------------
def _pick_tile(n, per_item_bytes, cfg, sublane_align=1):
    """Largest divisor of n that (a) fits the per-step byte budget,
    (b) leaves >= min_steps grid steps when the problem is big enough, and
    (c) respects a sublane-alignment requirement (full-array blocks exempt).
    The byte budget is authoritative.  Returns None only if an alignment
    requirement cannot be met within the budget."""
    total = n * per_item_bytes
    if total <= min(_MULTI_STEP_MIN_BYTES, cfg["step_budget"]):
        return n                               # tiny problem: one full block
    cap = max(1, cfg["step_budget"] // max(per_item_bytes, 1))
    cap = min(cap, n)
    if cfg["min_steps"] > 1 and n >= cfg["min_steps"]:
        cap = min(cap, max(1, n // cfg["min_steps"]))
    for t in range(cap, 0, -1):
        if n % t:
            continue
        if sublane_align > 1 and t % sublane_align and t != n:
            continue
        return t
    return None


# ----------------------------------------------------------------------------
# Pallas wrappers
# ----------------------------------------------------------------------------
def _beam_bmm(a3, b4, out_dtype, cfg):
    """(ngroups, beam, nhu) x (ngroups, beam, nhu, sz2) -> (ngroups, beam, sz2),
    reading only beam index 0 of b4 per group (the replicated representative)."""
    ngroups, beam, nhu = a3.shape
    sz2 = b4.shape[-1]
    isz = jnp.dtype(a3.dtype).itemsize
    per_group = (beam * nhu + nhu * sz2 + beam * sz2) * isz
    # No sublane-alignment requirement: every block's last two dims equal the
    # full array dims, so any divisor of ngroups is layout-valid.
    gt = _pick_tile(ngroups, per_group, cfg)
    grid = (ngroups // gt,)

    return pl.pallas_call(
        _beam_group_kernel,
        out_shape=jax.ShapeDtypeStruct((ngroups, beam, sz2), out_dtype),
        grid_spec=pltpu.PrefetchScalarGridSpec(
            num_scalar_prefetch=0,
            grid=grid,
            in_specs=[
                pl.BlockSpec((gt, beam, nhu), lambda i: (i, 0, 0)),
                # Beam axis squeezed: index 0 selects input2[::beam] and the
                # kernel receives the (gt, nhu, sz2) representative directly.
                pl.BlockSpec((gt, pl.Squeezed(), nhu, sz2),
                             lambda i: (i, 0, 0, 0)),
            ],
            out_specs=pl.BlockSpec((gt, beam, sz2), lambda i: (i, 0, 0)),
        ),
        compiler_params=pltpu.CompilerParams(
            dimension_semantics=("parallel",),
            vmem_limit_bytes=cfg["vmem_limit"],
        ),
    )(a3, b4)


def pallas_bmm(a, b, cast_to_bf16=False):
    """General batched matmul (B, M, K) x (B, K, N) -> (B, M, N)."""
    B, M, K = a.shape
    B2, K2, N = b.shape
    assert B == B2 and K == K2, (a.shape, b.shape)
    out_dtype = a.dtype
    cfg = _chip_config()
    if cast_to_bf16:
        a = a.astype(jnp.bfloat16)
        b = b.astype(jnp.bfloat16)
    isz = jnp.dtype(a.dtype).itemsize

    if M == 1:
        # Dense M=1 path: A as (B, K), O as (B, N) -> sublane/lane-dense tiles.
        per_item = (K + K * N + N) * isz
        bt = _pick_tile(B, per_item, cfg, sublane_align=8)
        if bt is not None:
            out2 = pl.pallas_call(
                _bmm_m1_kernel,
                out_shape=jax.ShapeDtypeStruct((B, N), out_dtype),
                grid_spec=pltpu.PrefetchScalarGridSpec(
                    num_scalar_prefetch=0,
                    grid=(B // bt,),
                    in_specs=[
                        pl.BlockSpec((bt, K), lambda i: (i, 0)),
                        pl.BlockSpec((bt, K, N), lambda i: (i, 0, 0)),
                    ],
                    out_specs=pl.BlockSpec((bt, N), lambda i: (i, 0)),
                ),
                compiler_params=pltpu.CompilerParams(
                    dimension_semantics=("parallel",),
                    vmem_limit_bytes=cfg["vmem_limit"],
                ),
            )(a[:, 0, :], b)
            return out2.reshape(B, 1, N)
        # else: no 8-aligned batch tile fits the budget -> general path below.

    per_item = (M * K + K * N + M * N) * isz
    bt = _pick_tile(B, per_item, cfg)        # align=1: always succeeds
    return pl.pallas_call(
        _bmm_kernel,
        out_shape=jax.ShapeDtypeStruct((B, M, N), out_dtype),
        grid_spec=pltpu.PrefetchScalarGridSpec(
            num_scalar_prefetch=0,
            grid=(B // bt,),
            in_specs=[
                pl.BlockSpec((bt, M, K), lambda i: (i, 0, 0)),
                pl.BlockSpec((bt, K, N), lambda i: (i, 0, 0)),
            ],
            out_specs=pl.BlockSpec((bt, M, N), lambda i: (i, 0, 0)),
        ),
        compiler_params=pltpu.CompilerParams(
            dimension_semantics=("parallel",),
            vmem_limit_bytes=cfg["vmem_limit"],
        ),
    )(a, b)


def beamable_mm(input1, input2, beam_size=None, training=False,
                cast_to_bf16=False):
    """JAX/Pallas equivalent of BeamableMM.forward.

    Beam path reads only input2[::beam] (the module assumes the source side is
    replicated `beam` times along batch); if that assumption is violated the
    result differs from a plain bmm, exactly as in fairseq.
    """
    if (
        (not training)
        and beam_size is not None
        and input1.ndim == 3
        and input1.shape[1] == 1
    ):
        bsz, beam = input1.shape[0], beam_size
        assert bsz % beam == 0, (bsz, beam)
        nhu = input1.shape[2]
        sz2 = input2.shape[2]
        ngroups = bsz // beam
        out_dtype = input1.dtype
        cfg = _chip_config()

        a, b = input1, input2
        if cast_to_bf16:
            a = a.astype(jnp.bfloat16)
            b = b.astype(jnp.bfloat16)

        # input1[:, 0, :].unfold(0, beam, beam).transpose(2, 1) -> (ngroups, beam, nhu)
        a3 = a[:, 0, :].reshape(ngroups, beam, nhu)
        # input2.unfold(0, beam, beam)[..., 0] == input2[::beam]: instead of a
        # strided HBM copy, reshape (free) and let the BlockSpec squeeze beam 0.
        b4 = b.reshape(ngroups, beam, nhu, sz2)

        out3 = _beam_bmm(a3, b4, out_dtype, cfg)     # (ngroups, beam, sz2)
        return out3.reshape(bsz, 1, sz2)             # .view(bsz, 1, -1): free
    else:
        return pallas_bmm(input1, input2, cast_to_bf16=cast_to_bf16)


if __name__ == "__main__":
    key = jax.random.PRNGKey(0)
    k1, k2 = jax.random.split(key)

    beam = 2
    bsz = 8          # divisible by beam
    nhu = 32
    sz2 = 16

    input1 = jax.random.normal(k1, (bsz, 1, nhu), dtype=jnp.float32)
    # Source side replicated `beam` times along batch (module assumption).
    src_base = jax.random.normal(k2, (bsz // beam, nhu, sz2), dtype=jnp.float32)
    input2 = jnp.repeat(src_base, beam, axis=0)      # (bsz, nhu, sz2)

    ref = jnp.einsum("bmk,bkn->bmn", input1, input2)

    # Optimized beam path (eval mode, beam_size set, width-1 target).
    out_beam = jax.block_until_ready(
        beamable_mm(input1, input2, beam_size=beam, training=False))
    assert out_beam.shape == (bsz, 1, sz2), out_beam.shape
    np.testing.assert_allclose(np.asarray(out_beam), np.asarray(ref),
                               rtol=1e-5, atol=1e-5)

    # Fallback path (plain batched matmul, dense M == 1 variant).
    out_plain = jax.block_until_ready(
        beamable_mm(input1, input2, beam_size=None, training=True))
    assert out_plain.shape == (bsz, 1, sz2), out_plain.shape
    np.testing.assert_allclose(np.asarray(out_plain), np.asarray(ref),
                               rtol=1e-5, atol=1e-5)

    # Optional bandwidth-saving bf16 input cast (f32 accumulation).
    out_bf16 = jax.block_until_ready(
        beamable_mm(input1, input2, beam_size=beam, training=False,
                    cast_to_bf16=True))
    assert out_bf16.shape == (bsz, 1, sz2), out_bf16.shape
    np.testing.assert_allclose(np.asarray(out_bf16), np.asarray(ref),
                               rtol=1e-1, atol=5e-1)

    print("KERNEL_OK")
</pallas_src>

<mosaic_0001>
module attributes {stable_mosaic.version = 11 : i64} {
  func.func @_beam_group_kernel(%arg0: i32, %arg1: memref<4x2x32xf32, #tpu.memory_space<vmem>>, %arg2: memref<4x1x32x16xf32, #tpu.memory_space<vmem>>, %arg3: memref<4x2x16xf32, #tpu.memory_space<vmem>>) attributes {dimension_semantics = [#tpu.dimension_semantics<parallel>], iteration_bounds = array<i64: 1>, scalar_prefetch = 0 : i64, scratch_operands = 0 : i64, tpu.core_type = #tpu.core_type<tc>, window_params = [{transform_indices = @transform_0, window_bounds = array<i64: 4, 2, 32>}, {transform_indices = @transform_1, window_bounds = array<i64: 4, 1, 32, 16>}, {transform_indices = @transform_2, window_bounds = array<i64: 4, 2, 16>}]} {
    %c0 = arith.constant 0 : index
    %c0_0 = arith.constant 0 : index
    %c0_1 = arith.constant 0 : index
    %0 = vector.load %arg1[%c0, %c0_0, %c0_1] : memref<4x2x32xf32, #tpu.memory_space<vmem>>, vector<4x2x32xf32>
    %c0_2 = arith.constant 0 : index
    %c0_3 = arith.constant 0 : index
    %c0_4 = arith.constant 0 : index
    %c0_5 = arith.constant 0 : index
    %1 = vector.load %arg2[%c0_2, %c0_3, %c0_4, %c0_5] : memref<4x1x32x16xf32, #tpu.memory_space<vmem>>, vector<4x1x32x16xf32>
    %2 = vector.shape_cast %1 : vector<4x1x32x16xf32> to vector<4x32x16xf32>
    "tpu.trace_start"() <{level = 10 : i32, message = "gbk,gkn->gbn"}> : () -> ()
    %cst = arith.constant dense<0.000000e+00> : vector<4x2x16xf32>
    %3 = tpu.matmul %0, %2, %cst {dimension_numbers = #tpu.dot_dimension_numbers<[2], [1], [1], [2], [0, 0, 0, 1, 1, 2], [0], [0]>} : vector<4x2x32xf32>, vector<4x32x16xf32>, vector<4x2x16xf32> -> vector<4x2x16xf32>
    "tpu.trace_stop"() : () -> ()
    %c0_6 = arith.constant 0 : index
    %c0_7 = arith.constant 0 : index
    %c0_8 = arith.constant 0 : index
    %4 = vector.load %arg3[%c0_6, %c0_7, %c0_8] : memref<4x2x16xf32, #tpu.memory_space<vmem>>, vector<4x2x16xf32>
    tpu.vector_store %arg3[%c0_6, %c0_7, %c0_8], %3 {strides = array<i32>} : memref<4x2x16xf32, #tpu.memory_space<vmem>>, vector<4x2x16xf32>,
    return
  }
  func.func @transform_0(%arg0: i32) -> (i32, i32, i32) {
    %c0_i32 = arith.constant 0 : i32
    %c0_i32_0 = arith.constant 0 : i32
    %c0_i32_1 = arith.constant 0 : i32
    return %arg0, %c0_i32, %c0_i32_0 : i32, i32, i32
  }
  func.func @transform_1(%arg0: i32) -> (i32, i32, i32, i32) {
    %c0_i32 = arith.constant 0 : i32
    %c0_i32_0 = arith.constant 0 : i32
    %c0_i32_1 = arith.constant 0 : i32
    %c0_i32_2 = arith.constant 0 : i32
    return %arg0, %c0_i32, %c0_i32_0, %c0_i32_1 : i32, i32, i32, i32
  }
  func.func @transform_2(%arg0: i32) -> (i32, i32, i32) {
    %c0_i32 = arith.constant 0 : i32
    %c0_i32_0 = arith.constant 0 : i32
    %c0_i32_1 = arith.constant 0 : i32
    return %arg0, %c0_i32, %c0_i32_0 : i32, i32, i32
  }
}

</mosaic_0001>

<bundles_post_ra>
// kernel: tpu_custom_call.1
= control target key start
LH: loop header
LB: loop body
LE: loop exit
PB: predicated region body
PF: predicated region fallthrough
CT: control target
= control target key end

     0   :  { %7 = vsyncpa [#allocation3], 0  ;;  %s631_s0 = inlined_call_operand.hbm [shape: f32[4,2,32], index: 0, kind: input, shape index: {}]   ;;  %s632_s1 = inlined_call_operand.hbm [shape: f32[4,2,32,16], index: 1, kind: input, shape index: {}]   ;;  %s633_s2 = inlined_call_operand.hbm [shape: f32[4,2,16], index: 2, kind: output, shape index: {}]  }
   0x1   :  { %8 = vsyncpa [#allocation6], 0 }
   0x2   :  { %9 = vsyncpa [#allocation4], 0  ;;  %s560_s9 = smov [#allocation2]   ;;  %s510_s13 = scalar_lea.hbm %s631_s0, 128 }
   0x3   :  { %s15_s10 = sshll.u32 %s560_s9, 4  ;;  %p511_p0 = scmp.ne.s32.totalorder %s631_s0, %s510_s13  ;;  %s16_s10 = int_to_ptr.vmem [resolvable:$true] %s15_s10 }
   0x4   :  { %p514_p1 = scmp.lt.u32.totalorder %s510_s13, %s631_s0 }
   0x6   :  { %p516_p2 = pnand %p514_p1, %p511_p0 }
   0x8   :  { %519 = shalt.err (!%p516_p2)
}
   0x9   :  { %s520_s18 = scalar_lea.vmem %s16_s10, 128  ;;  %p525_p4 = scmp.lt.s32.totalorder %s16_s10, %s16_s10 }
   0xa   :  { %p521_p3 = scmp.ne.s32.totalorder %s16_s10, %s520_s18  ;;  %p526_p5 = scmp.lt.s32.totalorder %s520_s18, %s520_s18 }
   0xc   :  { %p527_p6 = por %p526_p5, %p525_p4 }
   0xe   :  { %p528_p7 = pnand %p527_p6, %p521_p3 }
  0x10   :  { %531 = shalt.err (!%p528_p7)
}
  0x11   :  { %s561_s19 = smov 32   ;;  %s562_s20 = smov 2  }
  0x12   :  { %21 = dma.hbm_to_vmem [thread:$0]  %s631_s0, 128, %s16_s10, [#allocation3], %s561_s19, %s561_s19, %s562_s20  }
  0x13   :  { %s31_s23 = sld [smem:[#allocation0]]   ;;  %s563_s24 = smov [#allocation5]  }
  0x14   :  { %s39_s25 = sshll.u32 %s563_s24, 4  ;;  %s564_s26 = smov 1024   ;;  %s40_s25 = int_to_ptr.vmem [resolvable:$true] %s39_s25 }
  0x15   :  { %46 = sst [smem:[#allocation9]] %s564_s26  ;;  %s565_s27 = smov 512  }
  0x16   :  { %48 = sst [smem:[#allocation9 + $0x1]] %s565_s27  ;;  %s566_s28 = smov 4  }
  0x17   :  { %50 = sst [smem:[#allocation9 + $0x2]] %s566_s28  ;;  %s567_s30 = smov 128  }
  0x18   :  { %52 = sst [smem:[#allocation9 + $0x3]] %s567_s30  ;;  %s568_s4 = smov 8  }
  0x19   :  { %s401_s29 = sshll.u32 %s31_s23, 26  ;;  %54 = sst [smem:[#allocation9 + $0x4]] %s567_s30 }
  0x1a   :  { %s402_s3 = sadd.s32 134217728, %s401_s29  ;;  %56 = sst [smem:[#allocation9 + $0x5]] %s568_s4 }
  0x1b   :  { %s569_s5 = smov [#allocation6]   ;;  %s570_s6 = smov [#allocation8]  }
  0x1c   :  { %58 = dma.general %s632_s1, 2048, %s40_s25, %s569_s5, %s570_s6, [#allocation9], %s402_s3, 0  }
  0x1d   :  { %554 = dma.done.wait [#allocation3], 128  }
  0x1e   :  { %555 = vsyncadd [#allocation3], 4294967168 }
  0x1f   :  { %556 = dma.done.wait [#allocation6], 2048  }
  0x20   :  { %557 = vsyncadd [#allocation6], 4294965248  ;;  %v571_v0 = vmov 0.0|0.0   ;;  %vm572_vm0 = vmmov 0   ;;  %v573_v1 = vmov 0.0   ;;  %v69_v2 = vld [vmem:[#allocation5] sm:$0xff] }
  0x21   :  { %471 = vmatprep.subr.bf16.mxu0 %v571_v0  ;;  %477 = vmatprep.subr.bf16.mxu1 %v571_v0  ;;  %v70_v3 = vld [vmem:[#allocation5 + $0x8] sm:$0xff]  ;;  %v73_v4 = vld [vmem:[#allocation5 + $0x20] sm:$0xff]  ;;  %v71_v7 = vld [vmem:[#allocation5 + $0x10] sm:$0xff]  ;;  %vm85_vm1 = vcmask 261120   ;;  %vm378_vm2 = vcmask 123904   ;;  %s574_s1 = smov [#allocation7]  }
  0x22   :  { %435 = vmatprep.mubr.msk.f32.mxu0 %vm572_vm0, %v573_v1  ;;  %446 = vmatprep.mubr.msk.f32.mxu1 %vm572_vm0, %v573_v1  ;;  %v472_v5 = vpack.c.bf16 %v70_v3, %v69_v2  ;;  %v74_v6 = vld [vmem:[#allocation5 + $0x28] sm:$0xff]  ;;  %v72_v8 = vld [vmem:[#allocation5 + $0x18] sm:$0xff]  ;;  %v75_v10 = vld [vmem:[#allocation5 + $0x30] sm:$0xff]  ;;  %s388_s8 = sshll.u32 %s574_s1, 4  ;;  %s389_s8 = int_to_ptr.vmem [resolvable:$true] %s388_s8 }
  0x23   :  { %v478_v9 = vpack.c.bf16 %v74_v6, %v73_v4  ;;  %v76_v11 = vld [vmem:[#allocation5 + $0x38] sm:$0xff]  ;;  %v475_v12 = vpack.c.bf16 %v72_v8, %v71_v7  ;;  %v77_v14 = vld [vmem:[#allocation5 + $0x40] sm:$0xff]  ;;  %v78_v15 = vld [vmem:[#allocation5 + $0x48] sm:$0xff]  ;;  %s532_s9 = scalar_lea.vmem %s389_s8, 128  ;;  %p537_p9 = scmp.lt.s32.totalorder %s389_s8, %s389_s8 }
  0x24   :  { %473 = vmatpush3.bf16.msra.mxu0 %v472_v5  ;;  %v481_v13 = vpack.c.bf16 %v76_v11, %v75_v10  ;;  %v81_v16 = vld [vmem:[#allocation5 + $0x60] sm:$0xff]  ;;  %v82_v17 = vld [vmem:[#allocation5 + $0x68] sm:$0xff]  ;;  %v65_v18 = vld [vmem:[#allocation2] sm:$0x3]  ;;  %v484_v19 = vpack.c.bf16 %v78_v15, %v77_v14  ;;  %p533_p8 = scmp.ne.s32.totalorder %s389_s8, %s532_s9  ;;  %p538_p10 = scmp.lt.s32.totalorder %s532_s9, %s532_s9 }
  0x25   :  { %479 = vmatpush3.bf16.msra.mxu1 %v478_v9  ;;  %474 = vmatprep.subr.bf16.mxu0 %v571_v0  ;;  %v66_v20 = vld [vmem:[#allocation2 + $0x2] sm:$0x3]  ;;  %v490_v21 = vpack.c.bf16 %v82_v17, %v81_v16  ;;  %v79_v22 = vld [vmem:[#allocation5 + $0x50] sm:$0xff]  ;;  %v67_v28 = vld [vmem:[#allocation2 + $0x4] sm:$0x3] }
  0x26   :  { %480 = vmatprep.subr.bf16.mxu1 %v571_v0  ;;  %v80_v23 = vld [vmem:[#allocation5 + $0x58] sm:$0xff]  ;;  %v83_v24 = vld [vmem:[#allocation5 + $0x70] sm:$0xff]  ;;  %p539_p11 = por %p538_p10, %p537_p9 }
  0x27   :  { %v84_v25 = vld [vmem:[#allocation5 + $0x78] sm:$0xff]  ;;  %v487_v26 = vpack.c.bf16 %v80_v23, %v79_v22 }
  0x28   :  { %476 = vmatpush3.bf16.msra.mxu0 %v475_v12  ;;  %v493_v27 = vpack.c.bf16 %v84_v25, %v83_v24  ;;  %v68_v29 = vld [vmem:[#allocation2 + $0x6] sm:$0x3]  ;;  %p540_p12 = pnand %p539_p11, %p533_p8 }
  0x29   :  { %482 = vmatpush3.bf16.msra.mxu1 %v481_v13  ;;  %483 = vmatprep.subr.bf16.mxu0 %v571_v0 }
  0x2a   :  { %489 = vmatprep.subr.bf16.mxu1 %v571_v0 }
  0x2b   :  { %436 = vmatmul.mubr.msk.f32.vlgmr.msra.gmra.mrb[0].mxu0 %vm85_vm1, %v65_v18 }
  0x2c   :  { %447 = vmatmul.mubr.msk.f32.vlgmr.msra.gmra.mrb[0].mxu1 %vm85_vm1, %v66_v20  ;;  %485 = vmatpush3.bf16.msra.mxu0 %v484_v19 }
  0x2d   :  { %491 = vmatpush3.bf16.msra.mxu1 %v490_v21  ;;  %486 = vmatprep.subr.bf16.mxu0 %v571_v0 }
  0x2e   :  { %492 = vmatprep.subr.bf16.mxu1 %v571_v0  ;;  %457 = vmatprep.mubr.msk.f32.mxu0 %vm572_vm0, %v573_v1 }
  0x2f   :  { %468 = vmatprep.mubr.msk.f32.mxu1 %vm572_vm0, %v573_v1 }
  0x30   :  { %488 = vmatpush3.bf16.msra.mxu0 %v487_v26 }
  0x31   :  { %494 = vmatpush3.bf16.msra.mxu1 %v493_v27 }
  0x33   :  { %458 = vmatmul.mubr.msk.f32.vlgmr.msra.gmra.mrb[2].mxu0 %vm85_vm1, %v67_v28 }
  0x34   :  { %469 = vmatmul.mubr.msk.f32.vlgmr.msra.gmra.mrb[2].mxu1 %vm85_vm1, %v68_v29 }
  0xfe   :  { %v155_v30 = vpop.f32.mrb[0].mxu0 }
  0xff   :  { %379 = vst.msk [vmem:[#allocation7] sm:$0x3] %vm378_vm2, %v155_v30  ;;  %v228_v31 = vpop.f32.mrb[0].mxu1  ;;  %v437_v32 = vpop.f32.mrb[1].mxu0 }
 0x100   :  { %380 = vst.msk [vmem:[#allocation7 + $0x2] sm:$0x3] %vm378_vm2, %v228_v31  ;;  %v448_v33 = vpop.f32.mrb[1].mxu1 }
 0x106   :  { %v301_v34 = vpop.f32.mrb[2].mxu0 }
 0x107   :  { %381 = vst.msk [vmem:[#allocation7 + $0x4] sm:$0x3] %vm378_vm2, %v301_v34  ;;  %v374_v35 = vpop.f32.mrb[2].mxu1  ;;  %v459_v36 = vpop.f32.mrb[3].mxu0 }
 0x108   :  { %382 = vst.msk [vmem:[#allocation7 + $0x6] sm:$0x3] %vm378_vm2, %v374_v35  ;;  %v470_v37 = vpop.f32.mrb[3].mxu1 }
 0x109   :  { %543 = shalt.err (!%p540_p12)
}
 0x10a   :  { %s544_s12 = scalar_lea.hbm %s633_s2, 128 }
 0x10b   :  { %p545_p13 = scmp.ne.s32.totalorder %s633_s2, %s544_s12  ;;  %p548_p0 = scmp.lt.u32.totalorder %s544_s12, %s633_s2 }
 0x10d   :  { %p550_p1 = pnand %p548_p0, %p545_p13 }
 0x10f   :  { %553 = shalt.err (!%p550_p1)
}
 0x110   :  { %394 = dma.vmem_to_hbm [thread:$0]  %s389_s8, 128, %s633_s2, [#allocation4], %s561_s19, %s561_s19, %s562_s20  }
 0x111   :  { %558 = dma.done.wait [#allocation4], 128  }
 0x112   :  { %559 = vsyncadd [#allocation4], 4294967168 }
 0x113   :  { %398 = vsyncpa [#allocation3], 1 }
 0x114   :  { %399 = vsyncpa [#allocation6], 1 }
 0x115   :  { %400 = vsyncpa [#allocation4], 1 }

</bundles_post_ra>
